<compile_context>
chip_gen: v7x
topology: tpu7x:2x2x1
jax: 0.10.0
libtpu: 0.0.40
codegen_flags: <defaults>
</compile_context>

<pallas_src>
import jax
import jax.numpy as jnp
from jax.experimental import pallas as pl
from jax.experimental.pallas import tpu as pltpu


def _max_norm_kernel(x_ref, o_ref):
    # x_ref / o_ref: (rows, F) slab of the flattened input / output.
    x = x_ref[...]
    xf = x.astype(jnp.float32)
    # Per-row max (lane reduce on the XLU), keepdims so it broadcasts back.
    mx = jnp.max(xf, axis=-1, keepdims=True)
    # One reciprocal per row instead of a per-element divide; exact (approx=False)
    # to stay within ~1 ulp of the torch divide semantics.
    inv = pl.reciprocal(mx + 1e-8, approx=False)
    o_ref[...] = (xf * inv).astype(o_ref.dtype)


def _usable_vmem_bytes() -> int:
    """Per-generation VMEM budget with headroom for Mosaic internal scratch."""
    try:
        physical = int(pltpu.get_tpu_info().vmem_capacity_bytes)
    except Exception:
        physical = 64 << 20  # conservative: v7x has only 64 MiB per TensorCore
    #   v7x  (64 MiB physical)  -> ~48 MiB usable
    #   v5e/v6e (128 MiB)       -> ~102 MiB usable
    usable = min(int(physical * 0.8), physical - (16 << 20))
    return max(usable, 16 << 20)


def _choose_rows_per_block(b: int, feat: int, itemsize: int, is_f32: bool,
                           usable_vmem: int) -> int:
    sub = 16 if itemsize == 2 else 8  # sublane packing (bf16 packs 2x)
    if b <= sub:
        return b  # full-batch slab; full array dim is exempt from the 8-row rule
    f32_tmp = 0 if is_f32 else 4  # in-kernel f32 upcast temporary for low-precision inputs
    # pipelined VMEM per row: 2x input tile + 2x output tile + 2x f32 temp
    bytes_per_row = feat * (4 * itemsize + 2 * f32_tmp)
    headroom = 2 << 20
    max_rows_vmem = max(sub, ((usable_vmem - headroom) // bytes_per_row) // sub * sub)
    # streaming sweet spot: keep the input tile around a few MiB (>=1 MiB hits
    # ~85% of HBM roofline; bigger only helps until VMEM pressure bites)
    max_rows_tile = max(sub, ((8 << 20) // (feat * itemsize)) // sub * sub)
    # keep >= 2 grid steps so "parallel" can shard across both v7x TensorCores
    megacore_cap = max(sub, (pl.cdiv(b, 2) // sub) * sub)
    rows = min(max_rows_vmem, max_rows_tile, megacore_cap)
    return max(sub, min(rows, b))


def layernorm_forward(x: jax.Array) -> jax.Array:
    """Reproduces LayerNorm.forward: per-batch max-normalization x / (max + 1e-8).

    (Despite the name, the torch module computes no mean/var/affine.)
    """
    orig_shape = x.shape
    b = orig_shape[0]
    x2d = x.reshape(b, -1)
    feat = x2d.shape[1]
    dtype = x2d.dtype
    itemsize = jnp.dtype(dtype).itemsize
    is_f32 = dtype == jnp.float32

    usable = _usable_vmem_bytes()
    rows = _choose_rows_per_block(b, feat, itemsize, is_f32, usable)
    grid = (pl.cdiv(b, rows),)

    f32_tmp = 0 if is_f32 else 4
    needed = rows * feat * (4 * itemsize + 2 * f32_tmp) + (2 << 20)
    vmem_limit = int(min(usable, max(needed, 16 << 20)))
    # TODO(synk): for extremely large F (a single sub-row slab overflowing the
    # VMEM budget, ~350K f32 features on v7x), tile the feature axis with a
    # two-pass (running per-row max, then scale) structure.

    # No feature-axis padding: block last dim == full array dim is exempt from
    # the 128-lane divisibility rule; a masked tail vreg store is far cheaper
    # than the extra HBM pass of a host-side pad + slice.
    out2d = pl.pallas_call(
        _max_norm_kernel,
        out_shape=jax.ShapeDtypeStruct((b, feat), dtype),
        grid_spec=pltpu.PrefetchScalarGridSpec(
            num_scalar_prefetch=0,
            grid=grid,
            in_specs=[pl.BlockSpec((rows, feat), lambda i: (i, 0))],
            out_specs=pl.BlockSpec((rows, feat), lambda i: (i, 0)),
        ),
        compiler_params=pltpu.CompilerParams(
            dimension_semantics=("parallel",),  # row-slab axis is independent
            vmem_limit_bytes=vmem_limit,
        ),
    )(x2d)

    return out2d.reshape(orig_shape)


def _reference(x: jax.Array) -> jax.Array:
    x2d = x.reshape(x.shape[0], -1)
    mx = jnp.max(x2d, axis=-1, keepdims=True)
    return (x2d / (mx + 1e-8)).reshape(x.shape)


if __name__ == "__main__":
    key = jax.random.PRNGKey(0)

    # NCHW input, small shapes: batch=2, channels=4, spatial=16x16 -> F=1024
    x = jax.random.normal(key, (2, 4, 16, 16), dtype=jnp.float32)
    out = jax.block_until_ready(layernorm_forward(x))
    assert jnp.allclose(out, _reference(x), rtol=1e-5, atol=1e-6)

    # Secondary check: batch not a multiple of the row slab and F (=400) not a
    # multiple of 128 -> exercises the partial row block and masked tail store.
    key2 = jax.random.PRNGKey(0)
    x2 = jax.random.normal(key2, (10, 4, 10, 10), dtype=jnp.float32)
    out2 = jax.block_until_ready(layernorm_forward(x2))
    assert jnp.allclose(out2, _reference(x2), rtol=1e-5, atol=1e-6)

    print("KERNEL_OK")
</pallas_src>

<mosaic_0001>
module attributes {stable_mosaic.version = 11 : i64} {
  func.func @_max_norm_kernel(%arg0: i32, %arg1: memref<2x1024xf32, #tpu.memory_space<vmem>>, %arg2: memref<2x1024xf32, #tpu.memory_space<vmem>>) attributes {dimension_semantics = [#tpu.dimension_semantics<parallel>], iteration_bounds = array<i64: 1>, scalar_prefetch = 0 : i64, scratch_operands = 0 : i64, tpu.core_type = #tpu.core_type<tc>, window_params = [{transform_indices = @transform_0, window_bounds = array<i64: 2, 1024>}, {transform_indices = @transform_1, window_bounds = array<i64: 2, 1024>}]} {
    %c0 = arith.constant 0 : index
    %c0_0 = arith.constant 0 : index
    %0 = vector.load %arg1[%c0, %c0_0] : memref<2x1024xf32, #tpu.memory_space<vmem>>, vector<2x1024xf32>
    %cst = arith.constant dense<0xFF800000> : vector<2xf32>
    %1 = vector.multi_reduction <maximumf>, %0, %cst [1] : vector<2x1024xf32> to vector<2xf32>
    %2 = vector.shape_cast %1 : vector<2xf32> to vector<2x1xf32>
    %cst_1 = arith.constant 9.99999993E-9 : f32
    %3 = vector.broadcast %cst_1 : f32 to vector<2x1xf32>
    %4 = arith.addf %2, %3 : vector<2x1xf32>
    %5 = tpu.reciprocal %4 : vector<2x1xf32> -> vector<2x1xf32>
    %6 = vector.broadcast %5 : vector<2x1xf32> to vector<2x1024xf32>
    %7 = arith.mulf %0, %6 : vector<2x1024xf32>
    %c0_2 = arith.constant 0 : index
    %c0_3 = arith.constant 0 : index
    %8 = vector.load %arg2[%c0_2, %c0_3] : memref<2x1024xf32, #tpu.memory_space<vmem>>, vector<2x1024xf32>
    tpu.vector_store %arg2[%c0_2, %c0_3], %7 {strides = array<i32>} : memref<2x1024xf32, #tpu.memory_space<vmem>>, vector<2x1024xf32>,
    return
  }
  func.func @transform_0(%arg0: i32) -> (i32, i32) {
    %c0_i32 = arith.constant 0 : i32
    %c0_i32_0 = arith.constant 0 : i32
    return %arg0, %c0_i32 : i32, i32
  }
  func.func @transform_1(%arg0: i32) -> (i32, i32) {
    %c0_i32 = arith.constant 0 : i32
    %c0_i32_0 = arith.constant 0 : i32
    return %arg0, %c0_i32 : i32, i32
  }
}

</mosaic_0001>

<bundles_post_ra>
// kernel: tpu_custom_call.1
= control target key start
LH: loop header
LB: loop body
LE: loop exit
PB: predicated region body
PF: predicated region fallthrough
CT: control target
= control target key end

     0   :  { %6 = vsyncpa [#allocation3], 0  ;;  %s217_s0 = inlined_call_operand.hbm [shape: f32[2,1024], index: 0, kind: input, shape index: {}]   ;;  %s218_s1 = inlined_call_operand.hbm [shape: f32[2,1024], index: 1, kind: output, shape index: {}]  }
   0x1   :  { %7 = vsyncpa [#allocation4], 0  ;;  %s171_s6 = smov [#allocation2]   ;;  %s123_s10 = scalar_lea.hbm %s217_s0, 256 }
   0x2   :  { %s14_s7 = sshll.u32 %s171_s6, 4  ;;  %p124_p0 = scmp.ne.s32.totalorder %s217_s0, %s123_s10  ;;  %s15_s7 = int_to_ptr.vmem [resolvable:$true] %s14_s7 }
   0x3   :  { %p127_p1 = scmp.lt.u32.totalorder %s123_s10, %s217_s0 }
   0x5   :  { %p129_p2 = pnand %p127_p1, %p124_p0 }
   0x7   :  { %132 = shalt.err (!%p129_p2)
}
   0x8   :  { %s133_s15 = scalar_lea.vmem %s15_s7, 256  ;;  %p138_p4 = scmp.lt.s32.totalorder %s15_s7, %s15_s7 }
   0x9   :  { %p134_p3 = scmp.ne.s32.totalorder %s15_s7, %s133_s15  ;;  %p139_p5 = scmp.lt.s32.totalorder %s133_s15, %s133_s15 }
   0xb   :  { %p140_p6 = por %p139_p5, %p138_p4 }
   0xd   :  { %p141_p7 = pnand %p140_p6, %p134_p3 }
   0xf   :  { %144 = shalt.err (!%p141_p7)
}
  0x10   :  { %17 = dma.hbm_to_vmem [thread:$0]  %s217_s0, 256, %s15_s7, [#allocation3]  }
  0x11   :  { %167 = dma.done.wait [#allocation3], 256  }
  0x12   :  { %168 = vsyncadd [#allocation3], 4294967040  ;;  %v29_v0 = vlaneseq  ;;  %v172_v1 = vmov 1983009808   ;;  %v21_v6 = vld [vmem:[#allocation2] sm:$0xff]  ;;  %v22_v7 = vld [vmem:[#allocation2 + $0x8] sm:$0xff] }
  0x13   :  { %v27_v2 = vunpack.c.l.s4 %v172_v1  ;;  %vm67_vm0 = vcmask 1041408   ;;  %v25_v8 = vcombine.high %v21_v6, %v21_v6  ;;  %v42_v10 = vcombine.high %v22_v7, %v22_v7  ;;  %s174_s0 = smov [#allocation5]  }
  0x14   :  { %v30_v3 = vshrl.u32 %v29_v0, 7  ;;  %v173_v35 = vmov 269488144   ;;  %s106_s18 = sshll.u32 %s174_s0, 4  ;;  %s107_s18 = int_to_ptr.vmem [resolvable:$true] %s106_s18 }
  0x15   :  { %v28_v4 = vunpack.c.0.s8 %v27_v2  ;;  %v89_v36 = vunpack.c.l.s4 %v173_v35  ;;  %s145_s19 = scalar_lea.vmem %s107_s18, 256  ;;  %p150_p9 = scmp.lt.s32.totalorder %s107_s18, %s107_s18 }
  0x16   :  { %p146_p8 = scmp.ne.s32.totalorder %s107_s18, %s145_s19  ;;  %p151_p10 = scmp.lt.s32.totalorder %s145_s19, %s145_s19 }
  0x17   :  { %v31_v5 = vsub.s32 %v28_v4, %v30_v3  ;;  %v90_v37 = vunpack.c.0.s8 %v89_v36 }
  0x18   :  { %p152_p11 = por %p151_p10, %p150_p9 }
  0x19   :  { %v32_v9 = vrot.slane %v21_v6, %v31_v5  ;;  %v49_v11 = vrot.slane %v22_v7, %v31_v5  ;;  %v39_v12 = vrot.slane %v25_v8, %v31_v5  ;;  %v56_v14 = vrot.slane %v42_v10, %v31_v5 }
  0x1a   :  { %v93_v38 = vsub.s32 %v90_v37, %v30_v3  ;;  %p153_p12 = pnand %p152_p11, %p146_p8 }
  0x1b   :  { %v40_v13 = vcombine.high %v32_v9, %v32_v9  ;;  %v57_v15 = vcombine.high %v49_v11, %v49_v11  ;;  %v68_v16 = vsel %vm67_vm0, %v32_v9, -inf  ;;  %v72_v17 = vsel %vm67_vm0, %v49_v11, -inf }
  0x1c   :  { %v41_v18 = vcombine.high %v39_v12, %v39_v12  ;;  %v58_v19 = vcombine.high %v56_v14, %v56_v14  ;;  %v70_v21 = vsel %vm67_vm0, %v39_v12, -inf  ;;  %v73_v22 = vmax.f32 %v68_v16, %v72_v17 }
  0x1d   :  { %v69_v20 = vsel %vm67_vm0, %v40_v13, -inf  ;;  %v74_v23 = vsel %vm67_vm0, %v57_v15, -inf  ;;  %v76_v24 = vsel %vm67_vm0, %v56_v14, -inf }
  0x1e   :  { %v71_v25 = vsel %vm67_vm0, %v41_v18, -inf  ;;  %v75_v26 = vmax.f32 %v69_v20, %v74_v23  ;;  %v77_v27 = vmax.f32 %v70_v21, %v76_v24  ;;  %v78_v28 = vsel %vm67_vm0, %v58_v19, -inf }
  0x1f   :  { %v79_v29 = vmax.f32 %v71_v25, %v78_v28 }
  0x20   :  { %v80_v30 = vmax.f32 %v73_v22, %v75_v26 }
  0x21   :  { %v81_v31 = vmax.f32 %v77_v27, %v79_v29 }
  0x23   :  { %v82_v32 = vmax.f32 %v80_v30, %v81_v31 }
  0x25   :  { %83 = vmax.xlane.f32.xlu0 %v82_v32 }
  0xb2   :  { %v84_v33 = vpop.xlane.xlu0 %83 }
  0xb3   :  { %v85_v34 = vadd.f32 1e-08, %v84_v33 }
  0xb5   :  { %121 = vrcp.f32 %v85_v34 }
  0xbf   :  { %v122_v39 = vpop.eup %121 }
  0xc0   :  { %v94_v40 = vrot.slane %v122_v39, %v93_v38 }
  0xc2   :  { %v96_v41 = vmul.f32 %v94_v40, %v21_v6  ;;  %v97_v42 = vmul.f32 %v94_v40, %v22_v7 }
  0xc4   :  { %98 = vst [vmem:[#allocation5] sm:$0xff] %v96_v41  ;;  %99 = vst [vmem:[#allocation5 + $0x8] sm:$0xff] %v97_v42 }
  0xc5   :  { %156 = shalt.err (!%p153_p12)
}
  0xc6   :  { %s157_s22 = scalar_lea.hbm %s218_s1, 256 }
  0xc7   :  { %p158_p13 = scmp.ne.s32.totalorder %s218_s1, %s157_s22  ;;  %p161_p0 = scmp.lt.u32.totalorder %s157_s22, %s218_s1 }
  0xc9   :  { %p163_p1 = pnand %p161_p0, %p158_p13 }
  0xcb   :  { %166 = shalt.err (!%p163_p1)
}
  0xcc   :  { %109 = dma.vmem_to_hbm [thread:$0]  %s107_s18, 256, %s218_s1, [#allocation4]  }
  0xcd   :  { %169 = dma.done.wait [#allocation4], 256  }
  0xce   :  { %170 = vsyncadd [#allocation4], 4294967040 }
  0xcf   :  { %113 = vsyncpa [#allocation3], 1 }
  0xd0   :  { %114 = vsyncpa [#allocation4], 1 }

</bundles_post_ra>
